<compile_context>
chip_gen: v5e
topology: v5e:2x2
jax: 0.10.0
libtpu: 0.0.40
codegen_flags: <defaults>
</compile_context>

<pallas_src>
import jax
import jax.numpy as jnp
from jax import lax
from jax.experimental import pallas as pl
from jax.experimental.pallas import tpu as pltpu


COST_RATIO = 1000.0
BETA = 0.2
HALF_OVER_BETA = 0.5 / BETA     # precomputed: avoids a per-element divide
HALF_BETA = 0.5 * BETA

LANES = 128

_CORE_PARALLEL = getattr(pltpu, "CORE_PARALLEL", "parallel")


def _device_kind():
    try:
        return jax.devices()[0].device_kind.lower()
    except Exception:  # pragma: no cover - defensive
        return ""


def _num_tensorcores(kind):
    # v7x has 2 TensorCores per chip; v5e/v6e (and unknown) treated as 1.
    return 2 if ("v7" in kind or "tpu7" in kind) else 1


def _max_row_tile(kind):
    # Keep (double-buffered) input tiles comfortably under the default scoped
    # VMEM limit: 16 MiB on v5e and older -> 2 MiB tiles; 32 MiB on v6e/v7x
    # -> 4 MiB tiles.
    if any(tag in kind for tag in ("v2", "v3", "v4", "v5")):
        return 4096
    return 8192


def _make_dcp_kernel(n_rows, row_tile, steps, num_cores, chunk):
    """Streaming reduction: sum(relu(x)) and sum(smooth_l1(relu(-x)))."""
    n_chunks = row_tile // chunk
    coverage = num_cores * steps * row_tile
    ragged = coverage != n_rows          # static: does any step need masking?
    unroll = max(1, min(4, n_chunks))

    def kernel(x_ref, pos_ref, sl1_ref):
        if num_cores > 1:
            c = pl.program_id(0)
            i = pl.program_id(1)
        else:
            c = 0
            i = pl.program_id(0)
        b = c * steps + i                # logical row-block index

        # Zero this core's resident accumulators at its first reduction step.
        @pl.when(i == 0)
        def _():
            pos_ref[...] = jnp.zeros_like(pos_ref)
            sl1_ref[...] = jnp.zeros_like(sl1_ref)

        def accumulate(masked):
            if masked:
                valid = n_rows - b * row_tile   # valid rows of this block (<=0 ok)

            def chunk_body(j, carry):
                p_acc, s_acc = carry
                r0 = pl.multiple_of(j * chunk, chunk)
                x = x_ref[pl.ds(r0, chunk), :].astype(jnp.float32)
                # m = min(x, 0) == -relu(-x); relu(x) = max(x, 0)
                m = jnp.minimum(x, 0.0)
                pos = jnp.maximum(x, 0.0)
                # SmoothL1(beta) on d = -m >= 0:
                #   d < beta : 0.5*d^2/beta  == m*m*(0.5/beta)
                #   else     : d - 0.5*beta  == -0.5*beta - m
                sl1 = jnp.where(m > -BETA, m * m * HALF_OVER_BETA,
                                (-HALF_BETA) - m)
                if masked:
                    rows = r0 + lax.broadcasted_iota(jnp.int32, (chunk, 1), 0)
                    keep = rows < valid
                    pos = jnp.where(keep, pos, 0.0)
                    sl1 = jnp.where(keep, sl1, 0.0)
                return p_acc + pos, s_acc + sl1

            init = (jnp.zeros((chunk, LANES), jnp.float32),
                    jnp.zeros((chunk, LANES), jnp.float32))
            p_acc, s_acc = lax.fori_loop(0, n_chunks, chunk_body, init,
                                         unroll=unroll)
            # Fold the chunk-sized carry into the resident (8,128) accumulator.
            pos_ref[...] += p_acc.reshape(chunk // 8, 8, LANES).sum(axis=0)
            sl1_ref[...] += s_acc.reshape(chunk // 8, 8, LANES).sum(axis=0)

        if ragged:
            needs_mask = (b + 1) * row_tile > n_rows

            @pl.when(needs_mask)
            def _():
                accumulate(masked=True)

            @pl.when(jnp.logical_not(needs_mask))
            def _():
                accumulate(masked=False)
        else:
            accumulate(masked=False)

    return kernel


def dark_channel_prior_loss_v3(direct, depth=None, cost_ratio=COST_RATIO):
    """direct: NCHW (or any-shaped) array. Returns (bs_loss, zeros_like(direct))."""
    orig_shape = direct.shape
    orig_dtype = direct.dtype
    n_elems = int(direct.size)

    # Flatten (free reshape of a contiguous array) to a lane-dense slab.
    flat = direct.reshape(-1)
    rem = n_elems % LANES
    if rem:
        # TODO(synk): rare path (numel % 128 != 0) still pads <=127 zeros,
        # which is a full XLA copy; typical NCHW sizes take the free reshape.
        flat = jnp.pad(flat, (0, LANES - rem))
    n_rows = flat.size // LANES
    x2d = flat.reshape(n_rows, LANES)

    # Tiny-input corner: make sure at least one (8,128)-aligned row tile exists.
    if n_rows < 8:
        x2d = jnp.pad(x2d, ((0, 8 - n_rows), (0, 0)))
        n_rows = 8

    kind = _device_kind()
    num_cores = _num_tensorcores(kind)
    max_row_tile = _max_row_tile(kind)

    # Row tile: multiple of 8, never larger than the array (ragged tail is
    # masked in-kernel rather than padded in HBM).
    row_tile = min(max_row_tile, (n_rows // 8) * 8)
    chunk = 32 if row_tile % 32 == 0 else 8
    steps = -(-n_rows // (num_cores * row_tile))    # reduction steps per core
    max_blk = -(-n_rows // row_tile) - 1            # last in-bounds block index

    kernel = _make_dcp_kernel(n_rows, row_tile, steps, num_cores, chunk)

    if num_cores > 1:
        # v7x: shard the streaming reduction across both TensorCores; clamp
        # any logical block index past the array edge (its contribution is
        # fully masked in-kernel).
        grid = (num_cores, steps)
        in_specs = [pl.BlockSpec(
            (row_tile, LANES),
            lambda c, i: (jnp.minimum(c * steps + i, max_blk), 0))]
        out_specs = (pl.BlockSpec((8, LANES), lambda c, i: (c, 0)),
                     pl.BlockSpec((8, LANES), lambda c, i: (c, 0)))
        dims = (_CORE_PARALLEL, "arbitrary")
    else:
        # v5e / v6e: single TensorCore -> plain 1-D reduction grid.
        grid = (steps,)
        in_specs = [pl.BlockSpec((row_tile, LANES), lambda i: (i, 0))]
        out_specs = (pl.BlockSpec((8, LANES), lambda i: (0, 0)),
                     pl.BlockSpec((8, LANES), lambda i: (0, 0)))
        dims = ("arbitrary",)

    pos_acc, sl1_acc = pl.pallas_call(
        kernel,
        out_shape=(
            jax.ShapeDtypeStruct((num_cores * 8, LANES), jnp.float32),
            jax.ShapeDtypeStruct((num_cores * 8, LANES), jnp.float32),
        ),
        grid=grid,
        in_specs=in_specs,
        out_specs=out_specs,
        compiler_params=pltpu.CompilerParams(dimension_semantics=dims),
    )(x2d)

    denom = jnp.float32(n_elems)
    pos = jnp.sum(pos_acc) / denom
    neg = jnp.sum(sl1_acc) / denom
    bs_loss = cost_ratio * neg + pos

    # Second output of the module: zeros_like(direct). Pure broadcast/memset in
    # XLA -- not worth kernel HBM bandwidth.
    zeros_out = jnp.zeros(orig_shape, orig_dtype)
    return bs_loss, zeros_out


def _reference(direct, cost_ratio=COST_RATIO):
    x = direct.astype(jnp.float32)
    pos = jnp.mean(jnp.maximum(x, 0.0))
    d = jnp.maximum(-x, 0.0)
    sl1 = jnp.where(d < BETA, 0.5 * d * d / BETA, d - 0.5 * BETA)
    neg = jnp.mean(sl1)
    return cost_ratio * neg + pos


if __name__ == "__main__":
    key = jax.random.PRNGKey(0)
    # NCHW input, small shapes.
    direct = jax.random.normal(key, (2, 4, 16, 16), dtype=jnp.float32)

    bs_loss, zeros = jax.jit(dark_channel_prior_loss_v3)(direct)
    bs_loss = jax.block_until_ready(bs_loss)
    zeros = jax.block_until_ready(zeros)

    ref = _reference(direct)
    assert zeros.shape == direct.shape and zeros.dtype == direct.dtype
    assert jnp.all(zeros == 0.0)
    assert jnp.allclose(bs_loss, ref, rtol=1e-5, atol=1e-5), (bs_loss, ref)

    print("KERNEL_OK")
</pallas_src>

<mosaic_0001>
module attributes {stable_mosaic.version = 11 : i64} {
  func.func @kernel(%arg0: i32, %arg1: memref<16x128xf32, #tpu.memory_space<vmem>>, %arg2: memref<8x128xf32, #tpu.memory_space<vmem>>, %arg3: memref<8x128xf32, #tpu.memory_space<vmem>>) attributes {dimension_semantics = [#tpu.dimension_semantics<arbitrary>], iteration_bounds = array<i64: 1>, scalar_prefetch = 0 : i64, scratch_operands = 0 : i64, tpu.core_type = #tpu.core_type<tc>, window_params = [{transform_indices = @transform_0, window_bounds = array<i64: 16, 128>}, {pipeline_mode = #tpu.pipeline_mode<synchronous>, transform_indices = @transform_1, window_bounds = array<i64: 8, 128>}, {pipeline_mode = #tpu.pipeline_mode<synchronous>, transform_indices = @transform_2, window_bounds = array<i64: 8, 128>}]} {
    %c0_i32 = arith.constant 0 : i32
    %0 = arith.cmpi eq, %arg0, %c0_i32 : i32
    %1 = arith.extui %0 : i1 to i32
    %c0_i32_0 = arith.constant 0 : i32
    %2 = arith.cmpi ne, %1, %c0_i32_0 : i32
    scf.if %2 {
      %cst_25 = arith.constant 0.000000e+00 : f32
      %51 = vector.broadcast %cst_25 : f32 to vector<8x128xf32>
      %c0_26 = arith.constant 0 : index
      %c0_27 = arith.constant 0 : index
      %52 = vector.load %arg2[%c0_26, %c0_27] : memref<8x128xf32, #tpu.memory_space<vmem>>, vector<8x128xf32>
      tpu.vector_store %arg2[%c0_26, %c0_27], %51 {strides = array<i32>} : memref<8x128xf32, #tpu.memory_space<vmem>>, vector<8x128xf32>,
      %cst_28 = arith.constant 0.000000e+00 : f32
      %53 = vector.broadcast %cst_28 : f32 to vector<8x128xf32>
      %c0_29 = arith.constant 0 : index
      %c0_30 = arith.constant 0 : index
      %54 = vector.load %arg3[%c0_29, %c0_30] : memref<8x128xf32, #tpu.memory_space<vmem>>, vector<8x128xf32>
      tpu.vector_store %arg3[%c0_29, %c0_30], %53 {strides = array<i32>} : memref<8x128xf32, #tpu.memory_space<vmem>>, vector<8x128xf32>,
    } else {
    }
    %cst = arith.constant 0.000000e+00 : f32
    %3 = vector.broadcast %cst : f32 to vector<8x128xf32>
    %cst_1 = arith.constant 0.000000e+00 : f32
    %4 = vector.broadcast %cst_1 : f32 to vector<8x128xf32>
    %c0_i32_2 = arith.constant 0 : i32
    %c8_i32 = arith.constant 8 : i32
    %5 = arith.muli %c0_i32_2, %c8_i32 : i32
    %6 = tpu.assume_multiple %5, 8 : i32
    %7 = arith.index_cast %6 : i32 to index
    %c0 = arith.constant 0 : index
    %8 = vector.load %arg1[%7, %c0] : memref<16x128xf32, #tpu.memory_space<vmem>>, vector<8x128xf32>
    %cst_3 = arith.constant 0.000000e+00 : f32
    %9 = vector.broadcast %cst_3 : f32 to vector<8x128xf32>
    %10 = arith.minimumf %8, %9 : vector<8x128xf32>
    %cst_4 = arith.constant 0.000000e+00 : f32
    %11 = vector.broadcast %cst_4 : f32 to vector<8x128xf32>
    %12 = arith.maximumf %8, %11 : vector<8x128xf32>
    %cst_5 = arith.constant -2.000000e-01 : f32
    %13 = vector.broadcast %cst_5 : f32 to vector<8x128xf32>
    %14 = arith.cmpf ogt, %10, %13 : vector<8x128xf32>
    %15 = arith.mulf %10, %10 : vector<8x128xf32>
    %cst_6 = arith.constant 2.500000e+00 : f32
    %16 = vector.broadcast %cst_6 : f32 to vector<8x128xf32>
    %17 = arith.mulf %15, %16 : vector<8x128xf32>
    %cst_7 = arith.constant -1.000000e-01 : f32
    %18 = vector.broadcast %cst_7 : f32 to vector<8x128xf32>
    %19 = arith.subf %18, %10 : vector<8x128xf32>
    %20 = arith.select %14, %17, %19 : vector<8x128xi1>, vector<8x128xf32>
    %21 = arith.addf %3, %12 : vector<8x128xf32>
    %22 = arith.addf %4, %20 : vector<8x128xf32>
    %c1_i32 = arith.constant 1 : i32
    %c8_i32_8 = arith.constant 8 : i32
    %23 = arith.muli %c1_i32, %c8_i32_8 : i32
    %24 = tpu.assume_multiple %23, 8 : i32
    %25 = arith.index_cast %24 : i32 to index
    %c0_9 = arith.constant 0 : index
    %26 = vector.load %arg1[%25, %c0_9] : memref<16x128xf32, #tpu.memory_space<vmem>>, vector<8x128xf32>
    %cst_10 = arith.constant 0.000000e+00 : f32
    %27 = vector.broadcast %cst_10 : f32 to vector<8x128xf32>
    %28 = arith.minimumf %26, %27 : vector<8x128xf32>
    %cst_11 = arith.constant 0.000000e+00 : f32
    %29 = vector.broadcast %cst_11 : f32 to vector<8x128xf32>
    %30 = arith.maximumf %26, %29 : vector<8x128xf32>
    %cst_12 = arith.constant -2.000000e-01 : f32
    %31 = vector.broadcast %cst_12 : f32 to vector<8x128xf32>
    %32 = arith.cmpf ogt, %28, %31 : vector<8x128xf32>
    %33 = arith.mulf %28, %28 : vector<8x128xf32>
    %cst_13 = arith.constant 2.500000e+00 : f32
    %34 = vector.broadcast %cst_13 : f32 to vector<8x128xf32>
    %35 = arith.mulf %33, %34 : vector<8x128xf32>
    %cst_14 = arith.constant -1.000000e-01 : f32
    %36 = vector.broadcast %cst_14 : f32 to vector<8x128xf32>
    %37 = arith.subf %36, %28 : vector<8x128xf32>
    %38 = arith.select %32, %35, %37 : vector<8x128xi1>, vector<8x128xf32>
    %39 = arith.addf %21, %30 : vector<8x128xf32>
    %40 = arith.addf %22, %38 : vector<8x128xf32>
    %c2_i32 = arith.constant 2 : i32
    %c0_15 = arith.constant 0 : index
    %c0_16 = arith.constant 0 : index
    %41 = vector.load %arg2[%c0_15, %c0_16] : memref<8x128xf32, #tpu.memory_space<vmem>>, vector<8x128xf32>
    %42 = vector.shape_cast %39 : vector<8x128xf32> to vector<1x8x128xf32>
    %cst_17 = arith.constant dense<0.000000e+00> : vector<8x128xf32>
    %43 = vector.multi_reduction <add>, %42, %cst_17 [0] : vector<1x8x128xf32> to vector<8x128xf32>
    %44 = arith.addf %41, %43 : vector<8x128xf32>
    %c0_18 = arith.constant 0 : index
    %c0_19 = arith.constant 0 : index
    %45 = vector.load %arg2[%c0_18, %c0_19] : memref<8x128xf32, #tpu.memory_space<vmem>>, vector<8x128xf32>
    tpu.vector_store %arg2[%c0_18, %c0_19], %44 {strides = array<i32>} : memref<8x128xf32, #tpu.memory_space<vmem>>, vector<8x128xf32>,
    %c0_20 = arith.constant 0 : index
    %c0_21 = arith.constant 0 : index
    %46 = vector.load %arg3[%c0_20, %c0_21] : memref<8x128xf32, #tpu.memory_space<vmem>>, vector<8x128xf32>
    %47 = vector.shape_cast %40 : vector<8x128xf32> to vector<1x8x128xf32>
    %cst_22 = arith.constant dense<0.000000e+00> : vector<8x128xf32>
    %48 = vector.multi_reduction <add>, %47, %cst_22 [0] : vector<1x8x128xf32> to vector<8x128xf32>
    %49 = arith.addf %46, %48 : vector<8x128xf32>
    %c0_23 = arith.constant 0 : index
    %c0_24 = arith.constant 0 : index
    %50 = vector.load %arg3[%c0_23, %c0_24] : memref<8x128xf32, #tpu.memory_space<vmem>>, vector<8x128xf32>
    tpu.vector_store %arg3[%c0_23, %c0_24], %49 {strides = array<i32>} : memref<8x128xf32, #tpu.memory_space<vmem>>, vector<8x128xf32>,
    return
  }
  func.func @transform_0(%arg0: i32) -> (i32, i32) {
    %c0_i32 = arith.constant 0 : i32
    %c0_i32_0 = arith.constant 0 : i32
    return %arg0, %c0_i32 : i32, i32
  }
  func.func @transform_1(%arg0: i32) -> (i32, i32) {
    %c0_i32 = arith.constant 0 : i32
    %c0_i32_0 = arith.constant 0 : i32
    %c0_i32_1 = arith.constant 0 : i32
    return %c0_i32, %c0_i32_0 : i32, i32
  }
  func.func @transform_2(%arg0: i32) -> (i32, i32) {
    %c0_i32 = arith.constant 0 : i32
    %c0_i32_0 = arith.constant 0 : i32
    %c0_i32_1 = arith.constant 0 : i32
    return %c0_i32, %c0_i32_0 : i32, i32
  }
}

</mosaic_0001>

<bundles_post_ra>
// kernel: dark_channel_prior_loss_v3.1
= control target key start
LH: loop header
LB: loop body
LE: loop exit
PB: predicated region body
PF: predicated region fallthrough
CT: control target
= control target key end

     0   :  { %s82_s0 = inlined_call_operand.vmem [shape: f32[16,128], index: 0, kind: input, shape index: {}]   ;;  %s83_s1 = inlined_call_operand.vmem [shape: f32[8,128], index: 1, kind: output, shape index: {0}]   ;;  %s84_s2 = inlined_call_operand.vmem [shape: f32[8,128], index: 2, kind: output, shape index: {1}]  }
   0x1   :  { %v16_v0 = vld [vmem:[%s82_s0] sm:$0xff]  ;;  %v53_v1 = vld [vmem:[%s82_s0 + $0x8] sm:$0xff] }
   0x2   :  { %v17_v2 = vmin.f32 %v16_v0, 0.0  ;;  %v18_v3 = vmax.f32 %v16_v0, 0.0  ;;  %v28_v4 = vmin.f32 %v53_v1, 0.0  ;;  %v29_v5 = vmax.f32 %v53_v1, 0.0 }
   0x4   :  { %v35_v6 = vadd.f32 %v29_v5, %v18_v3  ;;  %v20_v7 = vmul.f32 %v17_v2, %v17_v2  ;;  %v22_v8 = vsub.f32 -0.1, %v17_v2  ;;  %vm19_vm0 = vcmp.gt.f32.partialorder %v17_v2, -0.2 }
   0x5   :  { %v31_v9 = vmul.f32 %v28_v4, %v28_v4  ;;  %v33_v10 = vsub.f32 -0.1, %v28_v4  ;;  %vm30_vm1 = vcmp.gt.f32.partialorder %v28_v4, -0.2 }
   0x6   :  { %v21_v11 = vmul.f32 2.5, %v20_v7  ;;  %40 = vst [vmem:[%s83_s1] sm:$0xff] %v35_v6 }
   0x7   :  { %v32_v12 = vmul.f32 2.5, %v31_v9 }
   0x8   :  { %v23_v13 = vsel %vm19_vm0, %v21_v11, %v22_v8 }
   0x9   :  { %v34_v14 = vsel %vm30_vm1, %v32_v12, %v33_v10 }
   0xa   :  { %v36_v15 = vadd.f32 %v34_v14, %v23_v13 }
   0xc   :  { %44 = vst [vmem:[%s84_s2] sm:$0xff] %v36_v15 }

</bundles_post_ra>
